<compile_context>
chip_gen: v5e
topology: v5e:2x2
jax: 0.10.0
libtpu: 0.0.40
codegen_flags: <defaults>
</compile_context>

<pallas_src>
import functools

import jax
import jax.numpy as jnp
from jax.experimental import pallas as pl
from jax.experimental.pallas import tpu as pltpu


def bert_layernorm_kernel(x_ref, w_ref, b_ref, o_ref, *, eps):
    # x_ref: (TM, H); w_ref/b_ref: (1, H); o_ref: (TM, H)
    x = x_ref[...].astype(jnp.float32)
    # Single pass over x: the two reductions are independent (no serial chain).
    mean = jnp.mean(x, axis=-1, keepdims=True)
    mean_sq = jnp.mean(x * x, axis=-1, keepdims=True)
    var = jnp.maximum(mean_sq - mean * mean, 0.0)     # guard tiny negative cancellation
    inv = jax.lax.rsqrt(var + eps)                    # eps inside the sqrt (BERT/TF style)
    w = w_ref[...].astype(jnp.float32)                # (1,H), resident across grid steps
    b = b_ref[...].astype(jnp.float32)
    o_ref[...] = (w * ((x - mean) * inv) + b).astype(o_ref.dtype)


def _floor_pow2(x):
    x = int(x)
    if x < 1:
        return 1
    p = 1
    while p * 2 <= x:
        p *= 2
    return p


def _tpu_generation_info():
    """(vmem_bytes, tile_budget_bytes, row_cap) tuned per TPU generation."""
    vmem = 64 * 1024 * 1024  # conservative fallback (v7x per-TC physical VMEM)
    try:
        vmem = int(pltpu.get_tpu_info().vmem_capacity_bytes)
    except Exception:
        pass
    kind = ""
    try:
        kind = jax.devices()[0].device_kind.lower()
    except Exception:
        pass
    is_v7 = ("v7" in kind) or ("7x" in kind)
    is_v5e = ("v5" in kind) and ("v5p" not in kind)
    if is_v7:
        # 3.2 TB/s: amortize the ~0.35 us per-grid-step overhead with big tiles;
        # keep the double-buffered in+out+f32-temp working set under ~40 MiB of 64.
        budget, row_cap = vmem // 2, 2048
    elif is_v5e:
        # ~820 GB/s: a 512-row tile's DMA time already dwarfs the step overhead.
        budget, row_cap = vmem // 4, 512
    else:
        # v6e / unknown: 512-1024 rows already sits at ~85% of HBM roofline.
        budget, row_cap = vmem // 4, 1024
    return vmem, budget, row_cap


def _per_row_bytes(hidden, in_itemsize, out_itemsize):
    # Double-buffered input tile + double-buffered output tile
    # + ~3 f32 temporaries (x_f32, x*x / centered copy, scaled result).
    return hidden * (2 * in_itemsize + 2 * out_itemsize + 3 * 4)


def _pick_row_tile(rows, hidden, in_dtype, out_dtype, align):
    """Largest power-of-two row tile whose working set fits the VMEM budget."""
    _, budget, row_cap = _tpu_generation_info()
    per_row = _per_row_bytes(hidden, jnp.dtype(in_dtype).itemsize,
                             jnp.dtype(out_dtype).itemsize)
    tm = budget // max(per_row, 1)
    tm = min(tm, row_cap)
    tm = max(align, _floor_pow2(tm))                 # pow2: divides typical row counts
    tm = min(tm, max(align, pl.next_power_of_2(rows)))  # don't over-allocate tiny inputs
    return int(tm)


def bert_layer_norm(x, weight, bias, eps=1e-12, *, row_tile=None):
    """LayerNorm over the last axis. x: [..., hidden]; weight, bias: [hidden]."""
    orig_shape = x.shape
    hidden = int(orig_shape[-1])
    rows = 1
    for d in orig_shape[:-1]:
        rows *= int(d)

    # TODO(synk): for production, keep hidden a multiple of 128 (lane-dense
    # stores); pad the feature axis outside the kernel for odd hidden sizes.

    x2 = x.reshape(rows, hidden)
    w2 = weight.reshape(1, hidden)
    b2 = bias.reshape(1, hidden)

    in_itemsize = jnp.dtype(x.dtype).itemsize
    align = 8 if in_itemsize >= 4 else (16 if in_itemsize == 2 else 32)

    if row_tile is None:
        tm = _pick_row_tile(rows, hidden, x.dtype, x.dtype, align)
    else:
        tm = max(align, _floor_pow2(int(row_tile)))

    # Ragged last block instead of jnp.pad + slice (no extra HBM passes).
    grid = pl.cdiv(rows, tm)

    vmem_cap, _, _ = _tpu_generation_info()
    working_set = tm * _per_row_bytes(hidden, in_itemsize, in_itemsize)
    vmem_limit = int(min(vmem_cap * 3 // 4,
                         max(2 * working_set, 32 * 1024 * 1024)))

    cost = pl.CostEstimate(
        flops=8 * rows * hidden,
        transcendentals=rows,                      # one rsqrt per row
        bytes_accessed=rows * hidden * 2 * in_itemsize + 2 * hidden * 4,
    )

    out = pl.pallas_call(
        functools.partial(bert_layernorm_kernel, eps=eps),
        out_shape=jax.ShapeDtypeStruct((rows, hidden), x.dtype),
        grid_spec=pltpu.PrefetchScalarGridSpec(
            num_scalar_prefetch=0,
            grid=(grid,),
            in_specs=[
                pl.BlockSpec((tm, hidden), lambda i: (i, 0)),
                pl.BlockSpec((1, hidden), lambda i: (0, 0)),   # weight: constant block
                pl.BlockSpec((1, hidden), lambda i: (0, 0)),   # bias: constant block
            ],
            out_specs=pl.BlockSpec((tm, hidden), lambda i: (i, 0)),
        ),
        compiler_params=pltpu.CompilerParams(
            # TODO(synk): if xprof shows only one TC busy on v7x, move the row
            # axis to CORE_PARALLEL / pl.core_map so both TCs stream rows.
            dimension_semantics=("parallel",),
            vmem_limit_bytes=vmem_limit,
        ),
        cost_estimate=cost,
    )(x2, w2, b2)

    return out.reshape(orig_shape)


def _reference(x, weight, bias, eps):
    x32 = x.astype(jnp.float32)
    u = jnp.mean(x32, axis=-1, keepdims=True)
    s = jnp.mean((x32 - u) ** 2, axis=-1, keepdims=True)
    y = weight.astype(jnp.float32) * ((x32 - u) / jnp.sqrt(s + eps)) + bias.astype(jnp.float32)
    return y.astype(x.dtype)


if __name__ == "__main__":
    key = jax.random.PRNGKey(0)

    # Small demo shapes consistent with the module (hidden=32 under-fills the
    # 128-lane dim; real BERT hidden sizes of 768/1024 are the perf target).
    batch, seq, hidden = 2, 8, 32
    x = jax.random.normal(key, (batch, seq, hidden), dtype=jnp.float32)
    weight = jnp.ones((hidden,), dtype=jnp.float32)   # nn.Parameter(torch.ones(H))
    bias = jnp.zeros((hidden,), dtype=jnp.float32)    # nn.Parameter(torch.zeros(H))

    y = jax.block_until_ready(bert_layer_norm(x, weight, bias, eps=1e-12))
    ref = _reference(x, weight, bias, 1e-12)
    assert jnp.allclose(y, ref, atol=1e-5, rtol=1e-5), "mismatch vs reference (f32)"

    # Ragged last block: rows not a multiple of the tile / sublanes.
    x_odd = jax.random.normal(jax.random.PRNGKey(1), (3, 5, hidden), dtype=jnp.float32)
    y_odd = jax.block_until_ready(bert_layer_norm(x_odd, weight, bias, eps=1e-12))
    ref_odd = _reference(x_odd, weight, bias, 1e-12)
    assert jnp.allclose(y_odd, ref_odd, atol=1e-5, rtol=1e-5), "mismatch (ragged rows)"

    # bf16 path (exercises the f32 upcast, single-pass stats and output cast).
    x_bf = (4.0 * jax.random.normal(jax.random.PRNGKey(2), (3, 5, hidden))).astype(jnp.bfloat16)
    w_bf = jnp.ones((hidden,), dtype=jnp.bfloat16)
    b_bf = jnp.zeros((hidden,), dtype=jnp.bfloat16)
    y_bf = jax.block_until_ready(bert_layer_norm(x_bf, w_bf, b_bf, eps=1e-12))
    ref_bf = _reference(x_bf, w_bf, b_bf, 1e-12)
    assert jnp.allclose(y_bf.astype(jnp.float32), ref_bf.astype(jnp.float32),
                        atol=3e-2, rtol=3e-2), "mismatch vs reference (bf16)"

    print("KERNEL_OK")
</pallas_src>

<mosaic_0001>
module attributes {stable_mosaic.version = 11 : i64} {
  func.func @bert_layernorm_kernel(%arg0: i32, %arg1: memref<16x32xf32, #tpu.memory_space<vmem>>, %arg2: memref<1x32xf32, #tpu.memory_space<vmem>>, %arg3: memref<1x32xf32, #tpu.memory_space<vmem>>, %arg4: memref<16x32xf32, #tpu.memory_space<vmem>>) attributes {dimension_semantics = [#tpu.dimension_semantics<parallel>], iteration_bounds = array<i64: 1>, scalar_prefetch = 0 : i64, scratch_operands = 0 : i64, tpu.core_type = #tpu.core_type<tc>, window_params = [{transform_indices = @transform_0, window_bounds = array<i64: 16, 32>}, {pipeline_mode = #tpu.pipeline_mode<synchronous>, transform_indices = @transform_1, window_bounds = array<i64: 1, 32>}, {pipeline_mode = #tpu.pipeline_mode<synchronous>, transform_indices = @transform_2, window_bounds = array<i64: 1, 32>}, {transform_indices = @transform_3, window_bounds = array<i64: 16, 32>}]} {
    %c0 = arith.constant 0 : index
    %c0_0 = arith.constant 0 : index
    %0 = vector.load %arg1[%c0, %c0_0] : memref<16x32xf32, #tpu.memory_space<vmem>>, vector<16x32xf32>
    %cst = arith.constant dense<0.000000e+00> : vector<16xf32>
    %1 = vector.multi_reduction <add>, %0, %cst [1] : vector<16x32xf32> to vector<16xf32>
    %2 = vector.shape_cast %1 : vector<16xf32> to vector<16x1xf32>
    %cst_1 = arith.constant 3.200000e+01 : f32
    %3 = vector.broadcast %cst_1 : f32 to vector<16x1xf32>
    %4 = arith.divf %2, %3 : vector<16x1xf32>
    %5 = arith.mulf %0, %0 : vector<16x32xf32>
    %cst_2 = arith.constant dense<0.000000e+00> : vector<16xf32>
    %6 = vector.multi_reduction <add>, %5, %cst_2 [1] : vector<16x32xf32> to vector<16xf32>
    %7 = vector.shape_cast %6 : vector<16xf32> to vector<16x1xf32>
    %cst_3 = arith.constant 3.200000e+01 : f32
    %8 = vector.broadcast %cst_3 : f32 to vector<16x1xf32>
    %9 = arith.divf %7, %8 : vector<16x1xf32>
    %10 = arith.mulf %4, %4 : vector<16x1xf32>
    %11 = arith.subf %9, %10 : vector<16x1xf32>
    %cst_4 = arith.constant 0.000000e+00 : f32
    %12 = vector.broadcast %cst_4 : f32 to vector<16x1xf32>
    %13 = arith.maximumf %11, %12 : vector<16x1xf32>
    %cst_5 = arith.constant 9.99999996E-13 : f32
    %14 = vector.broadcast %cst_5 : f32 to vector<16x1xf32>
    %15 = arith.addf %13, %14 : vector<16x1xf32>
    %16 = math.rsqrt %15 : vector<16x1xf32>
    %c0_6 = arith.constant 0 : index
    %c0_7 = arith.constant 0 : index
    %17 = vector.load %arg2[%c0_6, %c0_7] : memref<1x32xf32, #tpu.memory_space<vmem>>, vector<1x32xf32>
    %c0_8 = arith.constant 0 : index
    %c0_9 = arith.constant 0 : index
    %18 = vector.load %arg3[%c0_8, %c0_9] : memref<1x32xf32, #tpu.memory_space<vmem>>, vector<1x32xf32>
    %19 = vector.broadcast %4 : vector<16x1xf32> to vector<16x32xf32>
    %20 = arith.subf %0, %19 : vector<16x32xf32>
    %21 = vector.broadcast %16 : vector<16x1xf32> to vector<16x32xf32>
    %22 = arith.mulf %20, %21 : vector<16x32xf32>
    %23 = vector.broadcast %17 : vector<1x32xf32> to vector<16x32xf32>
    %24 = arith.mulf %23, %22 : vector<16x32xf32>
    %25 = vector.broadcast %18 : vector<1x32xf32> to vector<16x32xf32>
    %26 = arith.addf %24, %25 : vector<16x32xf32>
    %c0_10 = arith.constant 0 : index
    %c0_11 = arith.constant 0 : index
    %27 = vector.load %arg4[%c0_10, %c0_11] : memref<16x32xf32, #tpu.memory_space<vmem>>, vector<16x32xf32>
    tpu.vector_store %arg4[%c0_10, %c0_11], %26 {strides = array<i32>} : memref<16x32xf32, #tpu.memory_space<vmem>>, vector<16x32xf32>,
    return
  }
  func.func @transform_0(%arg0: i32) -> (i32, i32) {
    %c0_i32 = arith.constant 0 : i32
    %c0_i32_0 = arith.constant 0 : i32
    return %arg0, %c0_i32 : i32, i32
  }
  func.func @transform_1(%arg0: i32) -> (i32, i32) {
    %c0_i32 = arith.constant 0 : i32
    %c0_i32_0 = arith.constant 0 : i32
    %c0_i32_1 = arith.constant 0 : i32
    return %c0_i32, %c0_i32_0 : i32, i32
  }
  func.func @transform_2(%arg0: i32) -> (i32, i32) {
    %c0_i32 = arith.constant 0 : i32
    %c0_i32_0 = arith.constant 0 : i32
    %c0_i32_1 = arith.constant 0 : i32
    return %c0_i32, %c0_i32_0 : i32, i32
  }
  func.func @transform_3(%arg0: i32) -> (i32, i32) {
    %c0_i32 = arith.constant 0 : i32
    %c0_i32_0 = arith.constant 0 : i32
    return %arg0, %c0_i32 : i32, i32
  }
}

</mosaic_0001>

<bundles_post_ra>
// kernel: tpu_custom_call.1
= control target key start
LH: loop header
LB: loop body
LE: loop exit
PB: predicated region body
PF: predicated region fallthrough
CT: control target
= control target key end

     0   :  { %8 = vsyncpa [#allocation3], 0  ;;  %s287_s0 = inlined_call_operand.hbm [shape: f32[16,32], index: 0, kind: input, shape index: {}]   ;;  %s288_s1 = inlined_call_operand.hbm [shape: f32[1,32], index: 1, kind: input, shape index: {}]   ;;  %s289_s2 = inlined_call_operand.vmem [shape: f32[1,32], index: 2, kind: input, shape index: {}]   ;;  %s290_s3 = inlined_call_operand.hbm [shape: f32[16,32], index: 3, kind: output, shape index: {}]  }
   0x1   :  { %9 = vsyncpa [#allocation6], 0 }
   0x2   :  { %10 = vsyncpa [#allocation4], 0  ;;  %s15_s14 = sshll.u32 %s287_s0, 4  ;;  %s231_s15 = smov [#allocation2]   ;;  %s16_s14 = int_to_ptr.hbm [resolvable:$true] %s15_s14 }
   0x3   :  { %s17_s16 = sshll.u32 %s231_s15, 4  ;;  %s29_s19 = sshll.u32 %s288_s1, 4  ;;  %s18_s16 = int_to_ptr.vmem [resolvable:$true] %s17_s16  ;;  %s30_s19 = int_to_ptr.hbm [resolvable:$true] %s29_s19 }
   0x4   :  { %s232_s20 = smov 128   ;;  %s233_s21 = smov 8  }
   0x5   :  { %23 = dma.hbm_to_vmem [thread:$0]  %s16_s14, 256, %s18_s16, [#allocation3], %s232_s20, %s232_s20, %s233_s21  }
   0x6   :  { %s234_s22 = smov [#allocation5]  }
   0x7   :  { %s31_s23 = sshll.u32 %s234_s22, 4  ;;  %s32_s23 = int_to_ptr.vmem [resolvable:$true] %s31_s23 }
   0x8   :  { %34 = dma.hbm_to_vmem [thread:$0]  %s30_s19, 16, %s32_s23, [#allocation6]  }
   0x9   :  { %225 = dma.done.wait [#allocation3], 256  }
   0xa   :  { %226 = vsyncadd [#allocation3], 4294967040 }
   0xb   :  { %227 = dma.done.wait [#allocation6], 16  }
   0xc   :  { %228 = vsyncadd [#allocation6], 4294967280  ;;  %vm47_vm0 = vcmask 261120   ;;  %v45_v0 = vld [vmem:[#allocation2] sm:$0xff]  ;;  %v267_v3 = vld [vmem:[#allocation2 + $0x8] sm:$0xff]  ;;  %v235_v8 = vmov 32.0  }
   0xd   :  { %v48_v1 = vsel %vm47_vm0, %v45_v0, 0.0  ;;  %v63_v2 = vmul.f32 %v45_v0, %v45_v0  ;;  %v64_v5 = vmul.f32 %v267_v3, %v267_v3  ;;  %v51_v6 = vsel %vm47_vm0, %v267_v3, 0.0  ;;  %v145_v40 = vld [vmem:[#allocation5] ss:$0 sm:$0xff]  ;;  %v146_v44 = vld [vmem:[%s289_s2] ss:$0 sm:$0xff] }
   0xe   :  { %49 = vadd.xlane.f32.xlu0 %v48_v1  ;;  %147 = vrcp.f32 %v235_v8  ;;  %s236_s24 = smov [#allocation7]   ;;  %s125_s2 = sshll.u32 %s290_s3, 4  ;;  %s126_s2 = int_to_ptr.hbm [resolvable:$true] %s125_s2 }
   0xf   :  { %v65_v4 = vsel %vm47_vm0, %v63_v2, 0.0  ;;  %v68_v7 = vsel %vm47_vm0, %v64_v5, 0.0  ;;  %s123_s25 = sshll.u32 %s236_s24, 4  ;;  %s124_s25 = int_to_ptr.vmem [resolvable:$true] %s123_s25 }
  0x10   :  { %66 = vadd.xlane.f32.xlu1 %v65_v4 }
  0x14   :  { %v148_v9 = vpop.eup %147 }
  0x15   :  { %v55_v10 = vmul.f32 32.0, %v148_v9  ;;  %vm59_vm1 = vweird.f32 %v148_v9 }
  0x16   :  { %52 = vadd.xlane.f32.xlu0 %v51_v6 }
  0x17   :  { %v56_v11 = vsub.f32 1.0, %v55_v10 }
  0x18   :  { %69 = vadd.xlane.f32.xlu1 %v68_v7 }
  0x19   :  { %v57_v12 = vmul.f32 %v148_v9, %v56_v11 }
  0x1b   :  { %v58_v13 = vadd.f32 %v148_v9, %v57_v12 }
  0x1d   :  { %v60_v14 = vsel %vm59_vm1, %v148_v9, %v58_v13 }
  0x81   :  { %v50_v15 = vpop.xlane.xlu0 %49 }
  0x82   :  { %v61_v16 = vmul.f32 %v60_v14, %v50_v15 }
  0x83   :  { %v67_v17 = vpop.xlane.xlu1 %66 }
  0x84   :  { %v73_v18 = vmul.f32 %v61_v16, %v61_v16  ;;  %v71_v19 = vmul.f32 %v67_v17, %v60_v14  ;;  %v103_v38 = vsub.f32 %v45_v0, %v61_v16 }
  0x86   :  { %v75_v20 = vsub.f32 %v71_v19, %v73_v18 }
  0x88   :  { %v77_v21 = vmax.f32 %v75_v20, 0.0 }
  0x89   :  { %v53_v22 = vpop.xlane.xlu0 %52 }
  0x8a   :  { %v79_v23 = vadd.f32 1e-12, %v77_v21  ;;  %v62_v24 = vmul.f32 %v60_v14, %v53_v22 }
  0x8b   :  { %v70_v25 = vpop.xlane.xlu1 %69 }
  0x8c   :  { %149 = vrsqrt.f32 %v79_v23  ;;  %v74_v26 = vmul.f32 %v62_v24, %v62_v24  ;;  %v72_v27 = vmul.f32 %v70_v25, %v60_v14  ;;  %vm87_vm3 = vweird.f32 %v79_v23 }
  0x8d   :  { %v104_v50 = vsub.f32 %v267_v3, %v62_v24 }
  0x8e   :  { %v76_v28 = vsub.f32 %v72_v27, %v74_v26 }
  0x90   :  { %v78_v29 = vmax.f32 %v76_v28, 0.0 }
  0x92   :  { %v150_v30 = vpop.eup %149  ;;  %v80_v32 = vadd.f32 1e-12, %v78_v29 }
  0x93   :  { %v82_v31 = vmul.f32 %v150_v30, %v79_v23  ;;  %vm88_vm2 = vweird.f32 %v150_v30 }
  0x94   :  { %151 = vrsqrt.f32 %v80_v32  ;;  %vm89_vm4 = vmor %vm87_vm3, %vm88_vm2  ;;  %vm97_vm6 = vweird.f32 %v80_v32 }
  0x95   :  { %v83_v33 = vmul.f32 %v150_v30, %v82_v31 }
  0x97   :  { %v84_v34 = vmul.f32 0.5, %v83_v33 }
  0x99   :  { %v85_v35 = vsub.f32 1.5, %v84_v34 }
  0x9a   :  { %v152_v36 = vpop.eup %151 }
  0x9b   :  { %v86_v37 = vmul.f32 %v150_v30, %v85_v35  ;;  %v92_v39 = vmul.f32 %v152_v36, %v80_v32  ;;  %vm98_vm5 = vweird.f32 %v152_v36 }
  0x9c   :  { %vm99_vm7 = vmor %vm97_vm6, %vm98_vm5 }
  0x9d   :  { %v90_v41 = vsel %vm89_vm4, %v150_v30, %v86_v37  ;;  %v93_v43 = vmul.f32 %v152_v36, %v92_v39 }
  0x9e   :  { %v105_v42 = vmul.f32 %v103_v38, %v90_v41 }
  0x9f   :  { %v94_v45 = vmul.f32 0.5, %v93_v43 }
  0xa0   :  { %v110_v46 = vmul.f32 %v145_v40, %v105_v42 }
  0xa1   :  { %v95_v47 = vsub.f32 1.5, %v94_v45 }
  0xa2   :  { %v115_v48 = vadd.f32 %v146_v44, %v110_v46 }
  0xa3   :  { %v96_v49 = vmul.f32 %v152_v36, %v95_v47 }
  0xa4   :  { %117 = vst.msk [vmem:[#allocation7] sm:$0xff] %vm47_vm0, %v115_v48 }
  0xa5   :  { %v100_v51 = vsel %vm99_vm7, %v152_v36, %v96_v49 }
  0xa6   :  { %v106_v52 = vmul.f32 %v104_v50, %v100_v51 }
  0xa8   :  { %v111_v53 = vmul.f32 %v145_v40, %v106_v52 }
  0xaa   :  { %v116_v54 = vadd.f32 %v146_v44, %v111_v53 }
  0xac   :  { %118 = vst.msk [vmem:[#allocation7 + $0x8] sm:$0xff] %vm47_vm0, %v116_v54 }
  0xad   :  { %131 = dma.vmem_to_hbm [thread:$0]  %s124_s25, 256, %s126_s2, [#allocation4], %s232_s20, %s232_s20, %s233_s21  }
  0xae   :  { %229 = dma.done.wait [#allocation4], 256  }
  0xaf   :  { %230 = vsyncadd [#allocation4], 4294967040 }
  0xb0   :  { %136 = vsyncpa [#allocation3], 1 }
  0xb1   :  { %137 = vsyncpa [#allocation6], 1 }
  0xb2   :  { %138 = vsyncpa [#allocation4], 1 }

</bundles_post_ra>
